<compile_context>
chip_gen: v5e
topology: v5e:2x2
jax: 0.10.0
libtpu: 0.0.40
codegen_flags: <defaults>
</compile_context>

<pallas_src>
import jax
import jax.numpy as jnp
from jax.experimental import pallas as pl
from jax.experimental.pallas import tpu as pltpu

BN_EPS = 1e-5
_LANE = 128


def _round_up(x, m):
    return (x + m - 1) // m * m


def _make_mlp_kernel(num_layers):
    """Fused MLP kernel.

    Ref order (each one VMEM-resident operand == one DMA):
      x      (N, in_pad)            bf16  (zero-padded features)
      w1     (in_pad, H)            bf16  (zero-padded fan-in rows)
      whid   (L-1, H, H)            bf16  [only present if num_layers > 1]
      slab   (1 + 2*(L-1), H)       f32   row 0 = b1, rows 1+2i / 2+2i = gamma_i / beta_i
      wo     (H, out_pad)           bf16  (zero-padded to a multiple of 128 lanes)
      bo     (1, out_pad)           f32
      out    (N, out_pad)           f32
    """
    n_hidden = num_layers - 1

    def kernel(*refs):
        x_ref, w1_ref = refs[0], refs[1]
        if n_hidden > 0:
            whid_ref, slab_ref, wo_ref, bo_ref, out_ref = refs[2:]
        else:
            slab_ref, wo_ref, bo_ref, out_ref = refs[2:]
            whid_ref = None

        slab = slab_ref[...]          # single tiny f32 load for ALL small params
        b1 = slab[0:1, :]

        # ---- first Linear (+bias) + ReLU; lane-dense bf16 MXU inputs, f32 acc ----
        h = jnp.dot(x_ref[...], w1_ref[...], preferred_element_type=jnp.float32)
        h = jnp.maximum(h + b1, 0.0)

        n = h.shape[0]
        if n_hidden > 0:
            # Hoisted once: MXU column-sum probe (BN mean on the MXU, not the XLU).
            ones_rows = jnp.ones((8, n), jnp.float32)
            inv_n = jnp.float32(1.0 / n)

        # ---- hidden blocks: Linear (bias dropped: cancelled by BN mean subtraction)
        #      -> single-pass folded BatchNorm1d (training batch stats) -> ReLU ----
        for i in range(n_hidden):
            g = slab[1 + 2 * i:2 + 2 * i, :]
            be = slab[2 + 2 * i:3 + 2 * i, :]
            z = jnp.dot(h.astype(jnp.bfloat16), whid_ref[i],
                        preferred_element_type=jnp.float32)
            # Batch mean via MXU (f32 accumulation); E[z^2] stays on the XLU.
            mu = jnp.dot(ones_rows, z,
                         preferred_element_type=jnp.float32)[0:1, :] * inv_n
            var = jnp.maximum(jnp.mean(z * z, axis=0, keepdims=True) - mu * mu, 0.0)
            scale = g * jax.lax.rsqrt(var + BN_EPS)      # rsqrt -> EUP (free slot)
            shift = be - mu * scale
            h = jnp.maximum(z * scale + shift, 0.0)
            # TODO(synk): at H >= 256 compute E[z^2] blockwise (fori_loop over sublane
            # chunks) to avoid materializing full z*z and spilling vregs.

        # ---- output Linear (+bias), lane-dense padded store ----
        out = jnp.dot(h.astype(jnp.bfloat16), wo_ref[...],
                      preferred_element_type=jnp.float32) + bo_ref[...]
        out_ref[...] = out.astype(out_ref.dtype)

    return kernel


def _vmem_limit_bytes(operand_bytes):
    """Operand footprint + headroom, capped per TPU generation (v7x: 64 MiB VMEM/TC)."""
    needed = 2 * operand_bytes + (4 << 20)          # double-buffer + compiler scratch
    try:
        kind = jax.devices()[0].device_kind.lower()
    except Exception:  # pragma: no cover
        kind = ""
    cap = (100 << 20) if ("v5" in kind or "v6" in kind) else (48 << 20)
    return int(min(max(needed, 8 << 20), cap))


def prepare_params(params, num_layers):
    """ONE-TIME packing of the PyTorch-style flat param list
        [W1, b1] + [W, b, gamma, beta] * (num_layers - 1) + [Wo, bo]
    (weights as (fan_in, fan_out), vectors as (1, dim)) into kernel operands.
    Runs eagerly once; its outputs are reused by every forward call so no
    stack/pad/cast HLO appears in the hot path.
    Hidden-layer Linear biases are intentionally NOT shipped (BN cancels them)."""
    w1, b1 = params[0], params[1]
    in_dim, hidden_dim = w1.shape
    in_pad = max(_LANE, _round_up(in_dim, _LANE))

    idx = 2
    whid_list = []
    slab_rows = [b1.reshape(1, hidden_dim)]
    for _ in range(num_layers - 1):
        w, _b, g, be = params[idx], params[idx + 1], params[idx + 2], params[idx + 3]
        idx += 4
        whid_list.append(w)
        slab_rows += [g.reshape(1, hidden_dim), be.reshape(1, hidden_dim)]
    wo, bo = params[idx], params[idx + 1]
    out_dim = wo.shape[1]
    out_pad = max(_LANE, _round_up(out_dim, _LANE))

    w1_p = jnp.pad(w1.astype(jnp.bfloat16), ((0, in_pad - in_dim), (0, 0)))
    slab = jnp.concatenate(slab_rows, axis=0).astype(jnp.float32)
    wo_p = jnp.pad(wo.astype(jnp.bfloat16), ((0, 0), (0, out_pad - out_dim)))
    bo_p = jnp.pad(bo.reshape(1, out_dim).astype(jnp.float32),
                   ((0, 0), (0, out_pad - out_dim)))
    whid = (jnp.stack([w.astype(jnp.bfloat16) for w in whid_list], axis=0)
            if num_layers > 1 else None)
    # TODO(synk): when (L-1)*H*H*2B approaches ~48 MiB (v7x VMEM), switch whid to a
    # streamed layer-by-layer grid (BlockSpec (1,H,H)) / manual double buffer instead
    # of one resident slab.

    packed = (w1_p, whid, slab, wo_p, bo_p)
    meta = dict(num_layers=num_layers, in_dim=in_dim, in_pad=in_pad,
                hidden_dim=hidden_dim, out_dim=out_dim, out_pad=out_pad)
    return packed, meta


def mlp_forward(x, packed, meta):
    """Forward pass using pre-packed operands. Only per-call work: pad+cast x."""
    w1_p, whid, slab, wo_p, bo_p = packed
    n = x.shape[0]
    num_layers = meta["num_layers"]
    in_dim, in_pad = meta["in_dim"], meta["in_pad"]
    out_dim, out_pad = meta["out_dim"], meta["out_pad"]

    x_bf = jnp.pad(x, ((0, 0), (0, in_pad - in_dim))).astype(jnp.bfloat16)

    operands = [x_bf, w1_p]
    if whid is not None:
        operands.append(whid)
    operands += [slab, wo_p, bo_p]

    operand_bytes = sum(int(o.size) * o.dtype.itemsize for o in operands)
    operand_bytes += n * out_pad * 4

    vmem = pl.BlockSpec(memory_space=pltpu.MemorySpace.VMEM)
    out_padded = pl.pallas_call(
        _make_mlp_kernel(num_layers),
        out_shape=jax.ShapeDtypeStruct((n, out_pad), jnp.float32),
        in_specs=[vmem] * len(operands),
        out_specs=vmem,
        compiler_params=pltpu.CompilerParams(
            vmem_limit_bytes=_vmem_limit_bytes(operand_bytes)),
    )(*operands)
    # TODO(synk): for large N add a leading row-tile grid marked "parallel" (2nd TC on
    # v7x) with two-pass / partial-sum BN batch statistics.
    return out_padded[:, :out_dim]


def init_params(key, in_dim, hidden_dim, out_dim, num_layers):
    """PyTorch-like nn.Linear init (uniform +-1/sqrt(fan_in)), weights as (fan_in, fan_out).
    BN gamma=1, beta=0. Everything f32 (prepare_params quantizes once for the kernel)."""
    params = []

    def linear(key, fi, fo):
        k1, k2 = jax.random.split(key)
        bound = 1.0 / jnp.sqrt(jnp.float32(fi))
        w = jax.random.uniform(k1, (fi, fo), jnp.float32, -bound, bound)
        b = jax.random.uniform(k2, (1, fo), jnp.float32, -bound, bound)
        return w, b

    key, sub = jax.random.split(key)
    w, b = linear(sub, in_dim, hidden_dim)
    params += [w, b]

    for _ in range(num_layers - 1):
        key, sub = jax.random.split(key)
        w, b = linear(sub, hidden_dim, hidden_dim)
        params += [w, b, jnp.ones((1, hidden_dim), jnp.float32),
                   jnp.zeros((1, hidden_dim), jnp.float32)]

    key, sub = jax.random.split(key)
    w, b = linear(sub, hidden_dim, out_dim)
    params += [w, b]
    return params


def mlp_reference(x, params, num_layers):
    """Pure-JAX reference with PyTorch MLPModel semantics (hidden biases kept,
    textbook two-pass BatchNorm) using the same bf16 matmul-operand quantization."""
    bf = jnp.bfloat16
    w1, b1 = params[0], params[1]
    h = jnp.maximum(
        jnp.dot(x.astype(bf), w1.astype(bf), preferred_element_type=jnp.float32) + b1,
        0.0)
    idx = 2
    for _ in range(num_layers - 1):
        w, b, g, be = params[idx], params[idx + 1], params[idx + 2], params[idx + 3]
        idx += 4
        z = jnp.dot(h.astype(bf), w.astype(bf), preferred_element_type=jnp.float32) + b
        mu = jnp.mean(z, axis=0, keepdims=True)
        var = jnp.mean((z - mu) ** 2, axis=0, keepdims=True)
        z = (z - mu) * jax.lax.rsqrt(var + BN_EPS) * g + be
        h = jnp.maximum(z, 0.0)
    wo, bo = params[idx], params[idx + 1]
    return jnp.dot(h.astype(bf), wo.astype(bf), preferred_element_type=jnp.float32) + bo


if __name__ == "__main__":
    # Small shapes consistent with the module; hidden width lane-aligned (128).
    N, IN_DIM, HIDDEN_DIM, OUT_DIM, NUM_LAYERS = 128, 16, 128, 8, 3

    key = jax.random.PRNGKey(0)
    kx, kp = jax.random.split(key)
    x = jax.random.normal(kx, (N, IN_DIM), jnp.float32)
    params = init_params(kp, IN_DIM, HIDDEN_DIM, OUT_DIM, NUM_LAYERS)

    # One-time packing (off the hot path); jitted forward only touches x.
    packed, meta = prepare_params(params, NUM_LAYERS)
    run = jax.jit(lambda xx: mlp_forward(xx, packed, meta))

    out = jax.block_until_ready(run(x))

    ref = mlp_reference(x, params, NUM_LAYERS)
    assert out.shape == (N, OUT_DIM)
    max_err = float(jnp.max(jnp.abs(out - ref)))
    assert jnp.allclose(out, ref, atol=2e-3, rtol=2e-3), max_err

    print("KERNEL_OK")
</pallas_src>

<mosaic_0001>
module attributes {stable_mosaic.version = 11 : i64} {
  func.func @kernel(%arg0: memref<128x128xbf16, #tpu.memory_space<vmem>>, %arg1: memref<128x128xbf16, #tpu.memory_space<vmem>>, %arg2: memref<2x128x128xbf16, #tpu.memory_space<vmem>>, %arg3: memref<5x128xf32, #tpu.memory_space<vmem>>, %arg4: memref<128x128xbf16, #tpu.memory_space<vmem>>, %arg5: memref<1x128xf32, #tpu.memory_space<vmem>>, %arg6: memref<128x128xf32, #tpu.memory_space<vmem>>) attributes {dimension_semantics = [], scalar_prefetch = 0 : i64, scratch_operands = 0 : i64, tpu.core_type = #tpu.core_type<tc>} {
    %c0 = arith.constant 0 : index
    %c0_0 = arith.constant 0 : index
    %0 = vector.load %arg3[%c0, %c0_0] : memref<5x128xf32, #tpu.memory_space<vmem>>, vector<5x128xf32>
    %1 = vector.extract_strided_slice %0 {offsets = [0, 0], sizes = [1, 128], strides = [1, 1]} : vector<5x128xf32> to vector<1x128xf32>
    %c0_1 = arith.constant 0 : index
    %c0_2 = arith.constant 0 : index
    %2 = vector.load %arg0[%c0_1, %c0_2] : memref<128x128xbf16, #tpu.memory_space<vmem>>, vector<128x128xbf16>
    %c0_3 = arith.constant 0 : index
    %c0_4 = arith.constant 0 : index
    %3 = vector.load %arg1[%c0_3, %c0_4] : memref<128x128xbf16, #tpu.memory_space<vmem>>, vector<128x128xbf16>
    %cst = arith.constant dense<0.000000e+00> : vector<128x128xf32>
    %4 = tpu.matmul %2, %3, %cst {dimension_numbers = #tpu.dot_dimension_numbers<[1], [0], [0], [1], [0, 0, 1, 1], [], []>} : vector<128x128xbf16>, vector<128x128xbf16>, vector<128x128xf32> -> vector<128x128xf32>
    %5 = vector.broadcast %1 : vector<1x128xf32> to vector<128x128xf32>
    %6 = arith.addf %4, %5 : vector<128x128xf32>
    %cst_5 = arith.constant 0.000000e+00 : f32
    %7 = vector.broadcast %cst_5 : f32 to vector<128x128xf32>
    %8 = arith.maximumf %6, %7 : vector<128x128xf32>
    %cst_6 = arith.constant 1.000000e+00 : f32
    %9 = vector.broadcast %cst_6 : f32 to vector<8x128xf32>
    %10 = vector.extract_strided_slice %0 {offsets = [1, 0], sizes = [1, 128], strides = [1, 1]} : vector<5x128xf32> to vector<1x128xf32>
    %11 = vector.extract_strided_slice %0 {offsets = [2, 0], sizes = [1, 128], strides = [1, 1]} : vector<5x128xf32> to vector<1x128xf32>
    %12 = arith.truncf %8 : vector<128x128xf32> to vector<128x128xbf16>
    %c0_7 = arith.constant 0 : index
    %c0_8 = arith.constant 0 : index
    %c0_9 = arith.constant 0 : index
    %13 = vector.load %arg2[%c0_7, %c0_8, %c0_9] : memref<2x128x128xbf16, #tpu.memory_space<vmem>>, vector<1x128x128xbf16>
    %14 = vector.shape_cast %13 : vector<1x128x128xbf16> to vector<128x128xbf16>
    %cst_10 = arith.constant dense<0.000000e+00> : vector<128x128xf32>
    %15 = tpu.matmul %12, %14, %cst_10 {dimension_numbers = #tpu.dot_dimension_numbers<[1], [0], [0], [1], [0, 0, 1, 1], [], []>} : vector<128x128xbf16>, vector<128x128xbf16>, vector<128x128xf32> -> vector<128x128xf32>
    %cst_11 = arith.constant dense<0.000000e+00> : vector<8x128xf32>
    %16 = tpu.matmul %9, %15, %cst_11 {dimension_numbers = #tpu.dot_dimension_numbers<[1], [0], [0], [1], [0, 0, 1, 1], [], []>} : vector<8x128xf32>, vector<128x128xf32>, vector<8x128xf32> -> vector<8x128xf32>
    %17 = vector.extract_strided_slice %16 {offsets = [0, 0], sizes = [1, 128], strides = [1, 1]} : vector<8x128xf32> to vector<1x128xf32>
    %cst_12 = arith.constant 7.812500e-03 : f32
    %18 = vector.broadcast %cst_12 : f32 to vector<1x128xf32>
    %19 = arith.mulf %17, %18 : vector<1x128xf32>
    %20 = arith.mulf %15, %15 : vector<128x128xf32>
    %cst_13 = arith.constant dense<0.000000e+00> : vector<128xf32>
    %21 = vector.multi_reduction <add>, %20, %cst_13 [0] : vector<128x128xf32> to vector<128xf32>
    %22 = vector.shape_cast %21 : vector<128xf32> to vector<1x128xf32>
    %cst_14 = arith.constant 1.280000e+02 : f32
    %23 = vector.broadcast %cst_14 : f32 to vector<1x128xf32>
    %24 = arith.divf %22, %23 : vector<1x128xf32>
    %25 = arith.mulf %19, %19 : vector<1x128xf32>
    %26 = arith.subf %24, %25 : vector<1x128xf32>
    %cst_15 = arith.constant 0.000000e+00 : f32
    %27 = vector.broadcast %cst_15 : f32 to vector<1x128xf32>
    %28 = arith.maximumf %26, %27 : vector<1x128xf32>
    %cst_16 = arith.constant 9.99999974E-6 : f32
    %29 = vector.broadcast %cst_16 : f32 to vector<1x128xf32>
    %30 = arith.addf %28, %29 : vector<1x128xf32>
    %31 = math.rsqrt %30 : vector<1x128xf32>
    %32 = arith.mulf %10, %31 : vector<1x128xf32>
    %33 = arith.mulf %19, %32 : vector<1x128xf32>
    %34 = arith.subf %11, %33 : vector<1x128xf32>
    %35 = vector.broadcast %32 : vector<1x128xf32> to vector<128x128xf32>
    %36 = arith.mulf %15, %35 : vector<128x128xf32>
    %37 = vector.broadcast %34 : vector<1x128xf32> to vector<128x128xf32>
    %38 = arith.addf %36, %37 : vector<128x128xf32>
    %cst_17 = arith.constant 0.000000e+00 : f32
    %39 = vector.broadcast %cst_17 : f32 to vector<128x128xf32>
    %40 = arith.maximumf %38, %39 : vector<128x128xf32>
    %41 = vector.extract_strided_slice %0 {offsets = [3, 0], sizes = [1, 128], strides = [1, 1]} : vector<5x128xf32> to vector<1x128xf32>
    %42 = vector.extract_strided_slice %0 {offsets = [4, 0], sizes = [1, 128], strides = [1, 1]} : vector<5x128xf32> to vector<1x128xf32>
    %43 = arith.truncf %40 : vector<128x128xf32> to vector<128x128xbf16>
    %c1 = arith.constant 1 : index
    %c0_18 = arith.constant 0 : index
    %c0_19 = arith.constant 0 : index
    %44 = vector.load %arg2[%c1, %c0_18, %c0_19] : memref<2x128x128xbf16, #tpu.memory_space<vmem>>, vector<1x128x128xbf16>
    %45 = vector.shape_cast %44 : vector<1x128x128xbf16> to vector<128x128xbf16>
    %cst_20 = arith.constant dense<0.000000e+00> : vector<128x128xf32>
    %46 = tpu.matmul %43, %45, %cst_20 {dimension_numbers = #tpu.dot_dimension_numbers<[1], [0], [0], [1], [0, 0, 1, 1], [], []>} : vector<128x128xbf16>, vector<128x128xbf16>, vector<128x128xf32> -> vector<128x128xf32>
    %cst_21 = arith.constant dense<0.000000e+00> : vector<8x128xf32>
    %47 = tpu.matmul %9, %46, %cst_21 {dimension_numbers = #tpu.dot_dimension_numbers<[1], [0], [0], [1], [0, 0, 1, 1], [], []>} : vector<8x128xf32>, vector<128x128xf32>, vector<8x128xf32> -> vector<8x128xf32>
    %48 = vector.extract_strided_slice %47 {offsets = [0, 0], sizes = [1, 128], strides = [1, 1]} : vector<8x128xf32> to vector<1x128xf32>
    %cst_22 = arith.constant 7.812500e-03 : f32
    %49 = vector.broadcast %cst_22 : f32 to vector<1x128xf32>
    %50 = arith.mulf %48, %49 : vector<1x128xf32>
    %51 = arith.mulf %46, %46 : vector<128x128xf32>
    %cst_23 = arith.constant dense<0.000000e+00> : vector<128xf32>
    %52 = vector.multi_reduction <add>, %51, %cst_23 [0] : vector<128x128xf32> to vector<128xf32>
    %53 = vector.shape_cast %52 : vector<128xf32> to vector<1x128xf32>
    %cst_24 = arith.constant 1.280000e+02 : f32
    %54 = vector.broadcast %cst_24 : f32 to vector<1x128xf32>
    %55 = arith.divf %53, %54 : vector<1x128xf32>
    %56 = arith.mulf %50, %50 : vector<1x128xf32>
    %57 = arith.subf %55, %56 : vector<1x128xf32>
    %cst_25 = arith.constant 0.000000e+00 : f32
    %58 = vector.broadcast %cst_25 : f32 to vector<1x128xf32>
    %59 = arith.maximumf %57, %58 : vector<1x128xf32>
    %cst_26 = arith.constant 9.99999974E-6 : f32
    %60 = vector.broadcast %cst_26 : f32 to vector<1x128xf32>
    %61 = arith.addf %59, %60 : vector<1x128xf32>
    %62 = math.rsqrt %61 : vector<1x128xf32>
    %63 = arith.mulf %41, %62 : vector<1x128xf32>
    %64 = arith.mulf %50, %63 : vector<1x128xf32>
    %65 = arith.subf %42, %64 : vector<1x128xf32>
    %66 = vector.broadcast %63 : vector<1x128xf32> to vector<128x128xf32>
    %67 = arith.mulf %46, %66 : vector<128x128xf32>
    %68 = vector.broadcast %65 : vector<1x128xf32> to vector<128x128xf32>
    %69 = arith.addf %67, %68 : vector<128x128xf32>
    %cst_27 = arith.constant 0.000000e+00 : f32
    %70 = vector.broadcast %cst_27 : f32 to vector<128x128xf32>
    %71 = arith.maximumf %69, %70 : vector<128x128xf32>
    %72 = arith.truncf %71 : vector<128x128xf32> to vector<128x128xbf16>
    %c0_28 = arith.constant 0 : index
    %c0_29 = arith.constant 0 : index
    %73 = vector.load %arg4[%c0_28, %c0_29] : memref<128x128xbf16, #tpu.memory_space<vmem>>, vector<128x128xbf16>
    %cst_30 = arith.constant dense<0.000000e+00> : vector<128x128xf32>
    %74 = tpu.matmul %72, %73, %cst_30 {dimension_numbers = #tpu.dot_dimension_numbers<[1], [0], [0], [1], [0, 0, 1, 1], [], []>} : vector<128x128xbf16>, vector<128x128xbf16>, vector<128x128xf32> -> vector<128x128xf32>
    %c0_31 = arith.constant 0 : index
    %c0_32 = arith.constant 0 : index
    %75 = vector.load %arg5[%c0_31, %c0_32] : memref<1x128xf32, #tpu.memory_space<vmem>>, vector<1x128xf32>
    %76 = vector.broadcast %75 : vector<1x128xf32> to vector<128x128xf32>
    %77 = arith.addf %74, %76 : vector<128x128xf32>
    %c0_33 = arith.constant 0 : index
    %c0_34 = arith.constant 0 : index
    %78 = vector.load %arg6[%c0_33, %c0_34] : memref<128x128xf32, #tpu.memory_space<vmem>>, vector<128x128xf32>
    tpu.vector_store %arg6[%c0_33, %c0_34], %77 {strides = array<i32>} : memref<128x128xf32, #tpu.memory_space<vmem>>, vector<128x128xf32>,
    return
  }
}

</mosaic_0001>

<bundles_post_ra>
// kernel: _lambda_.1
= control target key start
LH: loop header
LB: loop body
LE: loop exit
PB: predicated region body
PF: predicated region fallthrough
CT: control target
= control target key end

     0   :  { %11 = vsyncpa [#allocation3], 0  ;;  %s1154_s24 = smov [#allocation2]   ;;  %s1155_s26 = smov 64   ;;  %s1552_s0 = inlined_call_operand.vmem [shape: bf16[128,128], index: 0, kind: input, shape index: {}]   ;;  %s1553_s1 = inlined_call_operand.hbm [shape: bf16[128,128], index: 1, kind: input, shape index: {}]   ;;  %s1554_s2 = inlined_call_operand.vmem [shape: bf16[2,128,128], index: 2, kind: input, shape index: {}]   ;;  %s1555_s3 = inlined_call_operand.vmem [shape: f32[5,128], index: 3, kind: input, shape index: {}]   ;;  %s1556_s4 = inlined_call_operand.vmem [shape: bf16[128,128], index: 4, kind: input, shape index: {}]   ;;  %s1557_s5 = inlined_call_operand.vmem [shape: f32[1,128], index: 5, kind: input, shape index: {}]   ;;  %s1558_s6 = inlined_call_operand.vmem [shape: f32[128,128], index: 6, kind: output, shape index: {}]  }
   0x1   :  { %s18_s23 = sshll.u32 %s1553_s1, 4  ;;  %s20_s25 = sshll.u32 %s1154_s24, 4  ;;  %s19_s23 = int_to_ptr.hbm [resolvable:$true] %s18_s23  ;;  %s21_s25 = int_to_ptr.vmem [resolvable:$true] %s20_s25 }
   0x2   :  { %s1156_s27 = smov 4  }
   0x3   :  { %26 = dma.hbm_to_vmem [thread:$0]  %s19_s23, 1024, %s21_s25, [#allocation3], %s1155_s26, %s1155_s26, %s1156_s27  }
   0x4   :  { %1152 = dma.done.wait [#allocation3], 1024  }
   0x5   :  { %1153 = vsyncadd [#allocation3], 4294966272  ;;  %v1091_v0 = vld [vmem:[#allocation2 + $0x38] sm:$0xff]  ;;  %v1090_v1 = vld [vmem:[#allocation2 + $0x30] sm:$0xff] }
   0x6   :  { %169 = vmatpush.bf16.msra.mxu0 %v1091_v0  ;;  %v1089_v2 = vld [vmem:[#allocation2 + $0x28] sm:$0xff]  ;;  %v1088_v3 = vld [vmem:[#allocation2 + $0x20] sm:$0xff]  ;;  %v1087_v4 = vld [vmem:[#allocation2 + $0x18] sm:$0xff] }
   0x7   :  { %v1086_v5 = vld [vmem:[#allocation2 + $0x10] sm:$0xff]  ;;  %v1085_v6 = vld [vmem:[#allocation2 + $0x8] sm:$0xff]  ;;  %v1084_v7 = vld [vmem:[#allocation2] sm:$0xff] }
   0x8   :  { %v1076_v8 = vld [vmem:[%s1552_s0] sm:$0xff]  ;;  %v1077_v9 = vld [vmem:[%s1552_s0 + $0x8] sm:$0xff]  ;;  %v1078_v10 = vld [vmem:[%s1552_s0 + $0x10] sm:$0xff] }
   0x9   :  { %v1079_v11 = vld [vmem:[%s1552_s0 + $0x18] sm:$0xff]  ;;  %v1080_v12 = vld [vmem:[%s1552_s0 + $0x20] sm:$0xff]  ;;  %v1081_v14 = vld [vmem:[%s1552_s0 + $0x28] sm:$0xff] }
   0xa   :  { %170 = vmatpush.bf16.msra.mxu0 %v1090_v1  ;;  %v1099_v13 = vld [vmem:[%s1554_s2 + $0x38] sm:$0xff]  ;;  %v1098_v15 = vld [vmem:[%s1554_s2 + $0x30] sm:$0xff]  ;;  %v1097_v16 = vld [vmem:[%s1554_s2 + $0x28] sm:$0xff] }
   0xb   :  { %306 = vmatpush.bf16.msra.mxu1 %v1099_v13  ;;  %v1096_v17 = vld [vmem:[%s1554_s2 + $0x20] sm:$0xff]  ;;  %v1095_v18 = vld [vmem:[%s1554_s2 + $0x18] sm:$0xff]  ;;  %v1082_v19 = vld [vmem:[%s1552_s0 + $0x30] sm:$0xff] }
   0xc   :  { %v1094_v20 = vld [vmem:[%s1554_s2 + $0x10] sm:$0xff]  ;;  %v1093_v21 = vld [vmem:[%s1554_s2 + $0x8] sm:$0xff]  ;;  %v1092_v22 = vld [vmem:[%s1554_s2] sm:$0xff] }
   0xd   :  { %v1083_v23 = vld [vmem:[%s1552_s0 + $0x38] sm:$0xff]  ;;  %v1248_v24 = vld [vmem:[%s1555_s3] sm:$0x1f] }
   0xe   :  { %171 = vmatpush.bf16.msra.mxu0 %v1089_v2  ;;  %v72_v26 = vperm.slane %v1248_v24, 0 }
   0xf   :  { %307 = vmatpush.bf16.msra.mxu1 %v1098_v15 }
  0x12   :  { %172 = vmatpush.bf16.msra.mxu0 %v1088_v3 }
  0x13   :  { %308 = vmatpush.bf16.msra.mxu1 %v1097_v16 }
  0x16   :  { %173 = vmatpush.bf16.msra.mxu0 %v1087_v4 }
  0x17   :  { %309 = vmatpush.bf16.msra.mxu1 %v1096_v17 }
  0x1a   :  { %174 = vmatpush.bf16.msra.mxu0 %v1086_v5 }
  0x1b   :  { %310 = vmatpush.bf16.msra.mxu1 %v1095_v18 }
  0x1e   :  { %175 = vmatpush.bf16.msra.mxu0 %v1085_v6 }
  0x1f   :  { %311 = vmatpush.bf16.msra.mxu1 %v1094_v20 }
  0x22   :  { %176 = vmatpush.bf16.msra.mxu0 %v1084_v7 }
  0x23   :  { %312 = vmatpush.bf16.msra.mxu1 %v1093_v21 }
  0x25   :  { %177 = vmatmul.bf16.vlgmr.msra.gmra.mxu0 %v1076_v8 }
  0x27   :  { %313 = vmatpush.bf16.msra.mxu1 %v1092_v22 }
  0x35   :  { %182 = vmatmul.bf16.gmra.mxu0 %v1077_v9 }
  0x45   :  { %187 = vmatmul.bf16.gmra.mxu0 %v1078_v10 }
  0x55   :  { %192 = vmatmul.bf16.gmra.mxu0 %v1079_v11 }
  0x65   :  { %197 = vmatmul.bf16.gmra.mxu0 %v1080_v12 }
  0x75   :  { %202 = vmatmul.bf16.gmra.mxu0 %v1081_v14 }
  0x85   :  { %207 = vmatmul.bf16.gmra.mxu0 %v1082_v19 }
  0x95   :  { %212 = vmatmul.bf16.gmra.mxu0 %v1083_v23 }
  0xa2   :  { %v178_v25 = vpop.f32.mrf.mxu0 }
  0xa3   :  { %v179_v27 = vadd.f32 %v178_v25, %v72_v26 }
  0xa5   :  { %v218_v30 = vmax.f32 %v179_v27, 0.0 }
  0xaa   :  { %v180_v28 = vpop.f32.mrf.mxu0 }
  0xab   :  { %v181_v29 = vadd.f32 %v180_v28, %v72_v26 }
  0xad   :  { %v219_v31 = vmax.f32 %v181_v29, 0.0 }
  0xaf   :  { %v234_v32 = vpack.c.bf16 %v219_v31, %v218_v30 }
  0xb1   :  { %314 = vmatmul.bf16.vlgmr.msra.gmra.mxu1 %v234_v32 }
  0xb2   :  { %v183_v33 = vpop.f32.mrf.mxu0 }
  0xb3   :  { %v184_v34 = vadd.f32 %v183_v33, %v72_v26 }
  0xb5   :  { %v220_v37 = vmax.f32 %v184_v34, 0.0 }
  0xba   :  { %v185_v35 = vpop.f32.mrf.mxu0 }
  0xbb   :  { %v186_v36 = vadd.f32 %v185_v35, %v72_v26  ;;  %v1157_v35 = vmov 1.0  }
  0xbd   :  { %v221_v38 = vmax.f32 %v186_v36, 0.0 }
  0xbf   :  { %v235_v39 = vpack.c.bf16 %v221_v38, %v220_v37 }
  0xc1   :  { %319 = vmatmul.bf16.gmra.mxu1 %v235_v39 }
  0xc2   :  { %v188_v40 = vpop.f32.mrf.mxu0 }
  0xc3   :  { %v189_v41 = vadd.f32 %v188_v40, %v72_v26 }
  0xc5   :  { %v222_v44 = vmax.f32 %v189_v41, 0.0 }
  0xca   :  { %v190_v42 = vpop.f32.mrf.mxu0 }
  0xcb   :  { %v191_v43 = vadd.f32 %v190_v42, %v72_v26 }
  0xcd   :  { %v223_v45 = vmax.f32 %v191_v43, 0.0 }
  0xcf   :  { %v236_v46 = vpack.c.bf16 %v223_v45, %v222_v44 }
  0xd1   :  { %324 = vmatmul.bf16.gmra.mxu1 %v236_v46 }
  0xd2   :  { %v193_v47 = vpop.f32.mrf.mxu0 }
  0xd3   :  { %v194_v48 = vadd.f32 %v193_v47, %v72_v26 }
  0xd5   :  { %v224_v51 = vmax.f32 %v194_v48, 0.0 }
  0xda   :  { %v195_v49 = vpop.f32.mrf.mxu0 }
  0xdb   :  { %v196_v50 = vadd.f32 %v195_v49, %v72_v26 }
  0xdd   :  { %v225_v52 = vmax.f32 %v196_v50, 0.0 }
  0xdf   :  { %v237_v53 = vpack.c.bf16 %v225_v52, %v224_v51 }
  0xe1   :  { %329 = vmatmul.bf16.gmra.mxu1 %v237_v53 }
  0xe2   :  { %v198_v54 = vpop.f32.mrf.mxu0 }
  0xe3   :  { %v199_v55 = vadd.f32 %v198_v54, %v72_v26 }
  0xe5   :  { %v226_v58 = vmax.f32 %v199_v55, 0.0 }
  0xea   :  { %v200_v56 = vpop.f32.mrf.mxu0 }
  0xeb   :  { %v201_v57 = vadd.f32 %v200_v56, %v72_v26 }
  0xed   :  { %v227_v59 = vmax.f32 %v201_v57, 0.0 }
  0xef   :  { %v238_v60 = vpack.c.bf16 %v227_v59, %v226_v58 }
  0xf1   :  { %334 = vmatmul.bf16.gmra.mxu1 %v238_v60 }
  0xf2   :  { %v203_v61 = vpop.f32.mrf.mxu0 }
  0xf3   :  { %v204_v62 = vadd.f32 %v203_v61, %v72_v26 }
  0xf5   :  { %v228_v1 = vmax.f32 %v204_v62, 0.0 }
  0xfa   :  { %v205_v63 = vpop.f32.mrf.mxu0 }
  0xfb   :  { %v206_v0 = vadd.f32 %v205_v63, %v72_v26 }
  0xfd   :  { %v229_v2 = vmax.f32 %v206_v0, 0.0 }
  0xff   :  { %v239_v3 = vpack.c.bf16 %v229_v2, %v228_v1 }
 0x101   :  { %339 = vmatmul.bf16.gmra.mxu1 %v239_v3  ;;  %v1158_v3 = vmov 128.0  }
 0x102   :  { %v208_v4 = vpop.f32.mrf.mxu0  ;;  %1122 = vrcp.f32 %v1158_v3 }
 0x103   :  { %v209_v5 = vadd.f32 %v208_v4, %v72_v26 }
 0x105   :  { %v230_v8 = vmax.f32 %v209_v5, 0.0 }
 0x108   :  { %v1123_v5 = vpop.eup %1122 }
 0x109   :  { %vm418_vm0 = vweird.f32 %v1123_v5 }
 0x10a   :  { %v210_v6 = vpop.f32.mrf.mxu0 }
 0x10b   :  { %v211_v7 = vadd.f32 %v210_v6, %v72_v26 }
 0x10d   :  { %v231_v9 = vmax.f32 %v211_v7, 0.0  ;;  %v414_v7 = vmul.f32 128.0, %v1123_v5 }
 0x10f   :  { %v240_v10 = vpack.c.bf16 %v231_v9, %v230_v8  ;;  %v1107_v8 = vld [vmem:[%s1554_s2 + $0x78] sm:$0xff] }
 0x110   :  { %570 = vmatpush.bf16.msra.mxu3 %v1107_v8 }
 0x111   :  { %344 = vmatmul.bf16.gmra.mxu1 %v240_v10  ;;  %v415_v10 = vsub.f32 1.0, %v414_v7 }
 0x112   :  { %v213_v11 = vpop.f32.mrf.mxu0 }
 0x113   :  { %v214_v12 = vadd.f32 %v213_v11, %v72_v26  ;;  %v1106_v11 = vld [vmem:[%s1554_s2 + $0x70] sm:$0xff] }
 0x114   :  { %571 = vmatpush.bf16.msra.mxu3 %v1106_v11 }
 0x115   :  { %v232_v15 = vmax.f32 %v214_v12, 0.0 }
 0x11a   :  { %v215_v13 = vpop.f32.mrf.mxu0 }
 0x11b   :  { %v216_v14 = vadd.f32 %v215_v13, %v72_v26  ;;  %v416_v13 = vmul.f32 %v1123_v5, %v415_v10 }
 0x11d   :  { %v233_v16 = vmax.f32 %v216_v14, 0.0  ;;  %v1105_v14 = vld [vmem:[%s1554_s2 + $0x68] sm:$0xff] }
 0x11e   :  { %572 = vmatpush.bf16.msra.mxu3 %v1105_v14 }
 0x11f   :  { %v241_v17 = vpack.c.bf16 %v233_v16, %v232_v15  ;;  %v417_v16 = vadd.f32 %v1123_v5, %v416_v13 }
 0x121   :  { %349 = vmatmul.bf16.gmra.mxu1 %v241_v17  ;;  %v1104_v17 = vld [vmem:[%s1554_s2 + $0x60] sm:$0xff] }
 0x122   :  { %573 = vmatpush.bf16.msra.mxu3 %v1104_v17 }
 0x12e   :  { %v1251_v18 = vpop.f32.mrf.mxu1 }
 0x12f   :  { %v376_v37 = vmul.f32 %v1251_v18, %v1251_v18 }
 0x136   :  { %v1253_v19 = vpop.f32.mrf.mxu1 }
 0x137   :  { %v377_v36 = vmul.f32 %v1253_v19, %v1253_v19 }
 0x139   :  { %v392_v39 = vadd.f32 %v377_v36, %v376_v37 }
 0x13e   :  { %v1255_v20 = vpop.f32.mrf.mxu1 }
 0x13f   :  { %v378_v38 = vmul.f32 %v1255_v20, %v1255_v20 }
 0x141   :  { %v393_v41 = vadd.f32 %v392_v39, %v378_v38  ;;  %v1344_v38 = vsel %vm418_vm0, %v1123_v5, %v417_v16  ;;  %v1103_v39 = vld [vmem:[%s1554_s2 + $0x58] sm:$0xff] }
 0x142   :  { %574 = vmatpush.bf16.msra.mxu3 %v1103_v39 }
 0x146   :  { %v1257_v21 = vpop.f32.mrf.mxu1 }
 0x147   :  { %v379_v40 = vmul.f32 %v1257_v21, %v1257_v21 }
 0x149   :  { %v394_v43 = vadd.f32 %v393_v41, %v379_v40 }
 0x14e   :  { %v1259_v22 = vpop.f32.mrf.mxu1 }
 0x14f   :  { %v380_v42 = vmul.f32 %v1259_v22, %v1259_v22 }
 0x151   :  { %v395_v45 = vadd.f32 %v394_v43, %v380_v42  ;;  %v1102_v43 = vld [vmem:[%s1554_s2 + $0x50] sm:$0xff] }
 0x152   :  { %575 = vmatpush.bf16.msra.mxu3 %v1102_v43 }
 0x156   :  { %v1261_v23 = vpop.f32.mrf.mxu1 }
 0x157   :  { %v381_v44 = vmul.f32 %v1261_v23, %v1261_v23 }
 0x159   :  { %v396_v47 = vadd.f32 %v395_v45, %v381_v44 }
 0x15e   :  { %v1263_v25 = vpop.f32.mrf.mxu1 }
 0x15f   :  { %v382_v46 = vmul.f32 %v1263_v25, %v1263_v25 }
 0x161   :  { %v397_v49 = vadd.f32 %v396_v47, %v382_v46  ;;  %v1101_v46 = vld [vmem:[%s1554_s2 + $0x48] sm:$0xff] }
 0x162   :  { %576 = vmatpush.bf16.msra.mxu3 %v1101_v46 }
 0x166   :  { %v1265_v27 = vpop.f32.mrf.mxu1 }
 0x167   :  { %v383_v48 = vmul.f32 %v1265_v27, %v1265_v27 }
 0x169   :  { %v398_v51 = vadd.f32 %v397_v49, %v383_v48  ;;  %v1100_v48 = vld [vmem:[%s1554_s2 + $0x40] sm:$0xff] }
 0x16a   :  { %577 = vmatpush.bf16.msra.mxu3 %v1100_v48 }
 0x16e   :  { %v1267_v26 = vpop.f32.mrf.mxu1 }
 0x16f   :  { %v384_v50 = vmul.f32 %v1267_v26, %v1267_v26 }
 0x171   :  { %v399_v53 = vadd.f32 %v398_v51, %v384_v50 }
 0x176   :  { %v1269_v28 = vpop.f32.mrf.mxu1 }
 0x177   :  { %v385_v52 = vmul.f32 %v1269_v28, %v1269_v28 }
 0x179   :  { %v400_v55 = vadd.f32 %v399_v53, %v385_v52 }
 0x17e   :  { %v1271_v29 = vpop.f32.mrf.mxu1 }
 0x17f   :  { %v386_v54 = vmul.f32 %v1271_v29, %v1271_v29 }
 0x181   :  { %v401_v57 = vadd.f32 %v400_v55, %v386_v54 }
 0x186   :  { %v1273_v30 = vpop.f32.mrf.mxu1 }
 0x187   :  { %v387_v56 = vmul.f32 %v1273_v30, %v1273_v30 }
 0x189   :  { %v402_v59 = vadd.f32 %v401_v57, %v387_v56 }
 0x18e   :  { %v1275_v31 = vpop.f32.mrf.mxu1 }
 0x18f   :  { %v388_v58 = vmul.f32 %v1275_v31, %v1275_v31 }
 0x191   :  { %v403_v61 = vadd.f32 %v402_v59, %v388_v58 }
 0x196   :  { %v1277_v32 = vpop.f32.mrf.mxu1 }
 0x197   :  { %v389_v60 = vmul.f32 %v1277_v32, %v1277_v32 }
 0x199   :  { %v404_v63 = vadd.f32 %v403_v61, %v389_v60 }
 0x19e   :  { %v1279_v33 = vpop.f32.mrf.mxu1 }
 0x19f   :  { %v390_v62 = vmul.f32 %v1279_v33, %v1279_v33 }
 0x1a1   :  { %v405_v1 = vadd.f32 %v404_v63, %v390_v62 }
 0x1a6   :  { %v1281_v34 = vpop.f32.mrf.mxu1 }
 0x1a7   :  { %355 = vmatpush.msrb.mxu0 %v1281_v34  ;;  %v391_v0 = vmul.f32 %v1281_v34, %v1281_v34 }
 0x1a9   :  { %356 = vmatpush.msrb.mxu0 %v1279_v33  ;;  %v406_v2 = vadd.f32 %v405_v1, %v391_v0 }
 0x1ab   :  { %357 = vmatpush.msrb.mxu0 %v1277_v32  ;;  %v407_v4 = vrot.slane %v406_v2, 4 }
 0x1ad   :  { %358 = vmatpush.msrb.mxu0 %v1275_v31  ;;  %v408_v6 = vadd.f32 %v407_v4, %v406_v2 }
 0x1af   :  { %359 = vmatpush.msrb.mxu0 %v1273_v30  ;;  %v409_v9 = vrot.slane %v408_v6, 2 }
 0x1b1   :  { %360 = vmatpush.msrb.mxu0 %v1271_v29  ;;  %v410_v12 = vadd.f32 %v409_v9, %v408_v6 }
 0x1b3   :  { %361 = vmatpush.msrb.mxu0 %v1269_v28  ;;  %v411_v15 = vrot.slane %v410_v12, 1 }
 0x1b5   :  { %362 = vmatpush.msrb.mxu0 %v1267_v26  ;;  %v412_v36 = vadd.f32 %v411_v15, %v410_v12 }
 0x1b7   :  { %363 = vmatpush.msrb.mxu0 %v1265_v27  ;;  %v420_v41 = vmul.f32 %v1344_v38, %v412_v36 }
 0x1b9   :  { %364 = vmatpush.msrb.mxu0 %v1263_v25 }
 0x1bb   :  { %365 = vmatpush.msrb.mxu0 %v1261_v23 }
 0x1bd   :  { %366 = vmatpush.msrb.mxu0 %v1259_v22 }
 0x1bf   :  { %367 = vmatpush.msrb.mxu0 %v1257_v21 }
 0x1c1   :  { %368 = vmatpush.msrb.mxu0 %v1255_v20 }
 0x1c3   :  { %369 = vmatpush.msrb.mxu0 %v1253_v19 }
 0x1c5   :  { %370 = vmatpush.msrb.mxu0 %v1251_v18 }
 0x1c6   :  { %371 = vmatmul.f32.vlgmr.msrb.gmra.mxu0 %v1157_v35 }
 0x243   :  { %v372_v37 = vpop.f32.mrf.mxu0 }
 0x244   :  { %v375_v40 = vmul.f32 0.0078125, %v372_v37 }
 0x246   :  { %v421_v42 = vmul.f32 %v375_v40, %v375_v40 }
 0x248   :  { %v422_v44 = vsub.f32 %v420_v41, %v421_v42 }
 0x24a   :  { %v423_v45 = vmax.f32 %v422_v44, 0.0 }
 0x24c   :  { %v424_v47 = vadd.f32 1e-05, %v423_v45 }
 0x24e   :  { %1124 = vrsqrt.f32 %v424_v47  ;;  %vm431_vm2 = vweird.f32 %v424_v47 }
 0x254   :  { %v1125_v49 = vpop.eup %1124 }
 0x255   :  { %v426_v50 = vmul.f32 %v1125_v49, %v424_v47  ;;  %vm432_vm1 = vweird.f32 %v1125_v49 }
 0x256   :  { %vm433_vm3 = vmor %vm431_vm2, %vm432_vm1 }
 0x257   :  { %v427_v51 = vmul.f32 %v1125_v49, %v426_v50 }
 0x259   :  { %v428_v52 = vmul.f32 0.5, %v427_v51 }
 0x25b   :  { %v429_v53 = vsub.f32 1.5, %v428_v52 }
 0x25d   :  { %v430_v54 = vmul.f32 %v1125_v49, %v429_v53 }
 0x25f   :  { %v434_v55 = vsel %vm433_vm3, %v1125_v49, %v430_v54 }
 0x260   :  { %v436_v56 = vrot.slane %v434_v55, 7 }
 0x262   :  { %v438_v57 = vmul.f32 %v436_v56, %v1248_v24 }
 0x264   :  { %v440_v58 = vrot.slane %v438_v57, 1  ;;  %v447_v61 = vperm.slane %v438_v57, 1 }
 0x266   :  { %v442_v59 = vmul.f32 %v440_v58, %v375_v40  ;;  %v448_v0 = vmul.f32 %v447_v61, %v1251_v18  ;;  %v449_v1 = vmul.f32 %v447_v61, %v1253_v19  ;;  %v456_v6 = vmul.f32 %v447_v61, %v1267_v26 }
 0x267   :  { %v457_v7 = vmul.f32 %v447_v61, %v1269_v28  ;;  %v458_v8 = vmul.f32 %v447_v61, %v1271_v29  ;;  %v459_v9 = vmul.f32 %v447_v61, %v1273_v30  ;;  %v460_v10 = vmul.f32 %v447_v61, %v1275_v31 }
 0x268   :  { %v444_v60 = vrot.slane %v442_v59, 6  ;;  %v461_v18 = vmul.f32 %v447_v61, %v1277_v32  ;;  %v462_v15 = vmul.f32 %v447_v61, %v1279_v33  ;;  %v463_v16 = vmul.f32 %v447_v61, %v1281_v34 }
 0x269   :  { %v450_v44 = vmul.f32 %v447_v61, %v1255_v20  ;;  %v451_v33 = vmul.f32 %v447_v61, %v1257_v21  ;;  %v452_v51 = vmul.f32 %v447_v61, %v1259_v22  ;;  %v453_v52 = vmul.f32 %v447_v61, %v1261_v23 }
 0x26a   :  { %v446_v62 = vsub.f32 %v1248_v24, %v444_v60  ;;  %v454_v20 = vmul.f32 %v447_v61, %v1263_v25  ;;  %v455_v21 = vmul.f32 %v447_v61, %v1265_v27 }
 0x26c   :  { %v464_v63 = vperm.slane %v446_v62, 2 }
 0x26e   :  { %v465_v2 = vadd.f32 %v464_v63, %v448_v0  ;;  %v466_v3 = vadd.f32 %v464_v63, %v449_v1  ;;  %v473_v12 = vadd.f32 %v464_v63, %v456_v6  ;;  %v474_v13 = vadd.f32 %v464_v63, %v457_v7 }
 0x26f   :  { %v475_v19 = vadd.f32 %v464_v63, %v458_v8  ;;  %v476_v14 = vadd.f32 %v464_v63, %v459_v9  ;;  %v477_v17 = vadd.f32 %v464_v63, %v460_v10  ;;  %v478_v29 = vadd.f32 %v464_v63, %v461_v18 }
 0x270   :  { %v481_v4 = vmax.f32 %v465_v2, 0.0  ;;  %v482_v5 = vmax.f32 %v466_v3, 0.0  ;;  %v489_v26 = vmax.f32 %v473_v12, 0.0  ;;  %v490_v28 = vmax.f32 %v474_v13, 0.0 }
 0x271   :  { %v491_v36 = vmax.f32 %v475_v19, 0.0  ;;  %v492_v30 = vmax.f32 %v476_v14, 0.0  ;;  %v479_v37 = vadd.f32 %v464_v63, %v462_v15  ;;  %v480_v31 = vadd.f32 %v464_v63, %v463_v16 }
 0x272   :  { %v497_v11 = vpack.c.bf16 %v482_v5, %v481_v4  ;;  %v501_v39 = vpack.c.bf16 %v490_v28, %v489_v26  ;;  %v493_v40 = vmax.f32 %v477_v17, 0.0  ;;  %v494_v41 = vmax.f32 %v478_v29, 0.0 }
 0x273   :  { %v502_v42 = vpack.c.bf16 %v492_v30, %v491_v36  ;;  %v495_v32 = vmax.f32 %v479_v37, 0.0  ;;  %v496_v43 = vmax.f32 %v480_v31, 0.0  ;;  %v467_v46 = vadd.f32 %v464_v63, %v450_v44 }
 0x274   :  { %578 = vmatmul.bf16.vlgmr.msra.gmra.mxu3 %v497_v11  ;;  %v503_v34 = vpack.c.bf16 %v494_v41, %v493_v40  ;;  %v468_v47 = vadd.f32 %v464_v63, %v451_v33  ;;  %v469_v53 = vadd.f32 %v464_v63, %v452_v51  ;;  %v470_v54 = vadd.f32 %v464_v63, %v453_v52 }
 0x275   :  { %v504_v45 = vpack.c.bf16 %v496_v43, %v495_v32  ;;  %v483_v48 = vmax.f32 %v467_v46, 0.0  ;;  %v471_v58 = vadd.f32 %v464_v63, %v454_v20  ;;  %v472_v59 = vadd.f32 %v464_v63, %v455_v21  ;;  %v1113_v20 = vld [vmem:[%s1556_s4 + $0x28] sm:$0xff] }
 0x276   :  { %v484_v49 = vmax.f32 %v468_v47, 0.0  ;;  %v485_v55 = vmax.f32 %v469_v53, 0.0  ;;  %v486_v56 = vmax.f32 %v470_v54, 0.0  ;;  %v1115_v54 = vld [vmem:[%s1556_s4 + $0x38] sm:$0xff] }
 0x277   :  { %v487_v60 = vmax.f32 %v471_v58, 0.0  ;;  %v488_v62 = vmax.f32 %v472_v59, 0.0  ;;  %830 = vmatpush.bf16.msra.mxu2 %v1115_v54 }
 0x278   :  { %v498_v50 = vpack.c.bf16 %v484_v49, %v483_v48  ;;  %v499_v57 = vpack.c.bf16 %v486_v56, %v485_v55  ;;  %v1114_v56 = vld [vmem:[%s1556_s4 + $0x30] sm:$0xff] }
 0x279   :  { %v500_v0 = vpack.c.bf16 %v488_v62, %v487_v60  ;;  %v1112_v62 = vld [vmem:[%s1556_s4 + $0x20] sm:$0xff] }
 0x27b   :  { %831 = vmatpush.bf16.msra.mxu2 %v1114_v56 }
 0x27f   :  { %832 = vmatpush.bf16.msra.mxu2 %v1113_v20 }
 0x283   :  { %833 = vmatpush.bf16.msra.mxu2 %v1112_v62 }
 0x284   :  { %583 = vmatmul.bf16.gmra.mxu3 %v498_v50 }
 0x294   :  { %588 = vmatmul.bf16.gmra.mxu3 %v499_v57 }
 0x2a4   :  { %593 = vmatmul.bf16.gmra.mxu3 %v500_v0 }
 0x2b4   :  { %598 = vmatmul.bf16.gmra.mxu3 %v501_v39 }
 0x2c4   :  { %603 = vmatmul.bf16.gmra.mxu3 %v502_v42 }
 0x2d4   :  { %608 = vmatmul.bf16.gmra.mxu3 %v503_v34 }
 0x2e4   :  { %613 = vmatmul.bf16.gmra.mxu3 %v504_v45 }
 0x2f7   :  { %v1377_v22 = vpop.f32.mrf.mxu3 }
 0x2f8   :  { %v640_v12 = vmul.f32 %v1377_v22, %v1377_v22 }
 0x2ff   :  { %v1379_v23 = vpop.f32.mrf.mxu3 }
 0x300   :  { %v641_v11 = vmul.f32 %v1379_v23, %v1379_v23 }
 0x302   :  { %v656_v18 = vadd.f32 %v641_v11, %v640_v12  ;;  %v1111_v12 = vld [vmem:[%s1556_s4 + $0x18] sm:$0xff] }
 0x303   :  { %834 = vmatpush.bf16.msra.mxu2 %v1111_v12 }
 0x307   :  { %v1381_v1 = vpop.f32.mrf.mxu3 }
 0x308   :  { %v642_v13 = vmul.f32 %v1381_v1, %v1381_v1 }
 0x30a   :  { %v657_v14 = vadd.f32 %v656_v18, %v642_v13  ;;  %v1110_v18 = vld [vmem:[%s1556_s4 + $0x10] sm:$0xff] }
 0x30b   :  { %835 = vmatpush.bf16.msra.mxu2 %v1110_v18 }
 0x30f   :  { %v1383_v2 = vpop.f32.mrf.mxu3 }
 0x310   :  { %v643_v19 = vmul.f32 %v1383_v2, %v1383_v2 }
 0x312   :  { %v658_v16 = vadd.f32 %v657_v14, %v643_v19  ;;  %v1108_v14 = vld [vmem:[%s1556_s4] sm:$0xff] }
 0x317   :  { %v1385_v25 = vpop.f32.mrf.mxu3 }
 0x318   :  { %v644_v15 = vmul.f32 %v1385_v25, %v1385_v25 }
 0x31a   :  { %v659_v26 = vadd.f32 %v658_v16, %v644_v15 }
 0x31f   :  { %v1387_v27 = vpop.f32.mrf.mxu3 }
 0x327   :  { %v1389_v61 = vpop.f32.mrf.mxu3 }
 0x328   :  { %v646_v28 = vmul.f32 %v1389_v61, %v1389_v61 }
 0x32f   :  { %v1391_v63 = vpop.f32.mrf.mxu3 }
 0x330   :  { %v647_v29 = vmul.f32 %v1391_v63, %v1391_v63 }
 0x337   :  { %v1393_v3 = vpop.f32.mrf.mxu3 }
 0x338   :  { %v648_v30 = vmul.f32 %v1393_v3, %v1393_v3 }
 0x33f   :  { %v1395_v4 = vpop.f32.mrf.mxu3 }
 0x340   :  { %v649_v31 = vmul.f32 %v1395_v4, %v1395_v4 }
 0x347   :  { %v1397_v5 = vpop.f32.mrf.mxu3 }
 0x348   :  { %v650_v40 = vmul.f32 %v1397_v5, %v1397_v5 }
 0x34f   :  { %v1399_v6 = vpop.f32.mrf.mxu3 }
 0x350   :  { %v651_v42 = vmul.f32 %v1399_v6, %v1399_v6 }
 0x357   :  { %v1401_v7 = vpop.f32.mrf.mxu3 }
 0x358   :  { %v652_v43 = vmul.f32 %v1401_v7, %v1401_v7 }
 0x35f   :  { %v1403_v8 = vpop.f32.mrf.mxu3 }
 0x360   :  { %v653_v33 = vmul.f32 %v1403_v8, %v1403_v8 }
 0x367   :  { %v1405_v9 = vpop.f32.mrf.mxu3 }
 0x368   :  { %v654_v45 = vmul.f32 %v1405_v9, %v1405_v9 }
 0x36f   :  { %v1407_v10 = vpop.f32.mrf.mxu3 }
 0x370   :  { %619 = vmatpush.msrb.mxu1 %v1407_v10  ;;  %v655_v47 = vmul.f32 %v1407_v10, %v1407_v10 }
 0x372   :  { %620 = vmatpush.msrb.mxu1 %v1405_v9 }
 0x374   :  { %621 = vmatpush.msrb.mxu1 %v1403_v8 }
 0x376   :  { %622 = vmatpush.msrb.mxu1 %v1401_v7 }
 0x378   :  { %623 = vmatpush.msrb.mxu1 %v1399_v6 }
 0x37a   :  { %624 = vmatpush.msrb.mxu1 %v1397_v5 }
 0x37c   :  { %625 = vmatpush.msrb.mxu1 %v1395_v4 }
 0x37e   :  { %626 = vmatpush.msrb.mxu1 %v1393_v3 }
 0x380   :  { %627 = vmatpush.msrb.mxu1 %v1391_v63 }
 0x382   :  { %628 = vmatpush.msrb.mxu1 %v1389_v61 }
 0x384   :  { %629 = vmatpush.msrb.mxu1 %v1387_v27 }
 0x386   :  { %630 = vmatpush.msrb.mxu1 %v1385_v25 }
 0x388   :  { %631 = vmatpush.msrb.mxu1 %v1383_v2 }
 0x38a   :  { %632 = vmatpush.msrb.mxu1 %v1381_v1 }
 0x38c   :  { %633 = vmatpush.msrb.mxu1 %v1379_v23 }
 0x38e   :  { %634 = vmatpush.msrb.mxu1 %v1377_v22 }
 0x38f   :  { %635 = vmatmul.f32.vlgmr.msrb.gmra.mxu1 %v1157_v35  ;;  %v645_v35 = vmul.f32 %v1387_v27, %v1387_v27 }
 0x391   :  { %v660_v17 = vadd.f32 %v659_v26, %v645_v35 }
 0x393   :  { %v661_v36 = vadd.f32 %v660_v17, %v646_v28 }
 0x395   :  { %v662_v37 = vadd.f32 %v661_v36, %v647_v29 }
 0x397   :  { %v663_v39 = vadd.f32 %v662_v37, %v648_v30 }
 0x399   :  { %v664_v41 = vadd.f32 %v663_v39, %v649_v31 }
 0x39b   :  { %v665_v32 = vadd.f32 %v664_v41, %v650_v40 }
 0x39d   :  { %v666_v44 = vadd.f32 %v665_v32, %v651_v42 }
 0x39f   :  { %v667_v34 = vadd.f32 %v666_v44, %v652_v43 }
 0x3a1   :  { %v668_v46 = vadd.f32 %v667_v34, %v653_v33 }
 0x3a3   :  { %v669_v48 = vadd.f32 %v668_v46, %v654_v45 }
 0x3a5   :  { %v670_v49 = vadd.f32 %v669_v48, %v655_v47 }
 0x3a7   :  { %v671_v50 = vrot.slane %v670_v49, 4 }
 0x3a9   :  { %v672_v51 = vadd.f32 %v671_v50, %v670_v49 }
 0x3ab   :  { %v673_v52 = vrot.slane %v672_v51, 2 }
 0x3ad   :  { %v674_v53 = vadd.f32 %v673_v52, %v672_v51 }
 0x3af   :  { %v675_v55 = vrot.slane %v674_v53, 1 }
 0x3b1   :  { %v676_v57 = vadd.f32 %v675_v55, %v674_v53 }
 0x3b3   :  { %v677_v59 = vmul.f32 %v676_v57, %v1344_v38  ;;  %v1109_v38 = vld [vmem:[%s1556_s4 + $0x8] sm:$0xff] }
 0x3b4   :  { %836 = vmatpush.bf16.msra.mxu2 %v1109_v38 }
 0x3b8   :  { %837 = vmatpush.bf16.msra.mxu2 %v1108_v14 }
 0x40c   :  { %v636_v21 = vpop.f32.mrf.mxu1 }
 0x40d   :  { %v639_v58 = vmul.f32 0.0078125, %v636_v21 }
 0x40f   :  { %v678_v60 = vmul.f32 %v639_v58, %v639_v58 }
 0x411   :  { %v679_v0 = vsub.f32 %v677_v59, %v678_v60 }
 0x413   :  { %v680_v11 = vmax.f32 %v679_v0, 0.0 }
 0x415   :  { %v681_v13 = vadd.f32 1e-05, %v680_v11 }
 0x417   :  { %1126 = vrsqrt.f32 %v681_v13  ;;  %vm688_vm5 = vweird.f32 %v681_v13 }
 0x41d   :  { %v1127_v19 = vpop.eup %1126 }
 0x41e   :  { %v683_v15 = vmul.f32 %v1127_v19, %v681_v13  ;;  %vm689_vm4 = vweird.f32 %v1127_v19 }
 0x41f   :  { %vm690_vm6 = vmor %vm688_vm5, %vm689_vm4 }
 0x420   :  { %v684_v16 = vmul.f32 %v1127_v19, %v683_v15 }
 0x422   :  { %v685_v35 = vmul.f32 0.5, %v684_v16 }
 0x424   :  { %v686_v26 = vsub.f32 1.5, %v685_v35 }
 0x426   :  { %v687_v28 = vmul.f32 %v1127_v19, %v686_v26 }
 0x428   :  { %v691_v17 = vsel %vm690_vm6, %v1127_v19, %v687_v28 }
 0x429   :  { %v693_v29 = vrot.slane %v691_v17, 5 }
 0x42b   :  { %v695_v36 = vmul.f32 %v693_v29, %v1248_v24 }
 0x42d   :  { %v697_v30 = vrot.slane %v695_v36, 3  ;;  %v704_v39 = vperm.slane %v695_v36, 3 }
 0x42f   :  { %v699_v37 = vmul.f32 %v697_v30, %v639_v58  ;;  %v705_v42 = vmul.f32 %v704_v39, %v1377_v22  ;;  %v706_v32 = vmul.f32 %v704_v39, %v1379_v23  ;;  %v713_v45 = vmul.f32 %v704_v39, %v1393_v3 }
 0x430   :  { %v714_v46 = vmul.f32 %v704_v39, %v1395_v4  ;;  %v715_v47 = vmul.f32 %v704_v39, %v1397_v5  ;;  %v716_v48 = vmul.f32 %v704_v39, %v1399_v6  ;;  %v717_v49 = vmul.f32 %v704_v39, %v1401_v7 }
 0x431   :  { %v701_v31 = vrot.slane %v699_v37, 4  ;;  %v718_v22 = vmul.f32 %v704_v39, %v1403_v8  ;;  %v719_v53 = vmul.f32 %v704_v39, %v1405_v9  ;;  %v720_v54 = vmul.f32 %v704_v39, %v1407_v10 }
 0x432   :  { %v707_v62 = vmul.f32 %v704_v39, %v1381_v1  ;;  %v708_v9 = vmul.f32 %v704_v39, %v1383_v2  ;;  %v709_v19 = vmul.f32 %v704_v39, %v1385_v25  ;;  %v710_v14 = vmul.f32 %v704_v39, %v1387_v27  ;;  %v1121_v25 = vld [vmem:[%s1557_s5] ss:$0 sm:$0xff] }
 0x433   :  { %v703_v40 = vsub.f32 %v1248_v24, %v701_v31  ;;  %v711_v1 = vmul.f32 %v704_v39, %v1389_v61  ;;  %v712_v2 = vmul.f32 %v704_v39, %v1391_v63 }
 0x435   :  { %v721_v41 = vperm.slane %v703_v40, 4 }
 0x437   :  { %v722_v43 = vadd.f32 %v721_v41, %v705_v42  ;;  %v723_v44 = vadd.f32 %v721_v41, %v706_v32  ;;  %v730_v50 = vadd.f32 %v721_v41, %v713_v45  ;;  %v731_v51 = vadd.f32 %v721_v41, %v714_v46 }
 0x438   :  { %v732_v23 = vadd.f32 %v721_v41, %v715_v47  ;;  %v733_v52 = vadd.f32 %v721_v41, %v716_v48  ;;  %v734_v55 = vadd.f32 %v721_v41, %v717_v49  ;;  %v735_v5 = vadd.f32 %v721_v41, %v718_v22 }
 0x439   :  { %v738_v33 = vmax.f32 %v722_v43, 0.0  ;;  %v739_v34 = vmax.f32 %v723_v44, 0.0  ;;  %v746_v3 = vmax.f32 %v730_v50, 0.0  ;;  %v747_v4 = vmax.f32 %v731_v51, 0.0 }
 0x43a   :  { %v748_v56 = vmax.f32 %v732_v23, 0.0  ;;  %v749_v6 = vmax.f32 %v733_v52, 0.0  ;;  %v736_v57 = vadd.f32 %v721_v41, %v719_v53  ;;  %v737_v7 = vadd.f32 %v721_v41, %v720_v54 }
 0x43b   :  { %v754_v24 = vpack.c.bf16 %v739_v34, %v738_v33  ;;  %v758_v20 = vpack.c.bf16 %v747_v4, %v746_v3  ;;  %v750_v21 = vmax.f32 %v734_v55, 0.0  ;;  %v751_v58 = vmax.f32 %v735_v5, 0.0 }
 0x43c   :  { %v759_v59 = vpack.c.bf16 %v749_v6, %v748_v56  ;;  %v752_v8 = vmax.f32 %v736_v57, 0.0  ;;  %v753_v60 = vmax.f32 %v737_v7, 0.0  ;;  %v724_v11 = vadd.f32 %v721_v41, %v707_v62 }
 0x43d   :  { %838 = vmatmul.bf16.vlgmr.msra.gmra.mxu2 %v754_v24  ;;  %v760_v10 = vpack.c.bf16 %v751_v58, %v750_v21  ;;  %v725_v12 = vadd.f32 %v721_v41, %v708_v9  ;;  %v726_v15 = vadd.f32 %v721_v41, %v709_v19  ;;  %v727_v16 = vadd.f32 %v721_v41, %v710_v14 }
 0x43e   :  { %v761_v0 = vpack.c.bf16 %v753_v60, %v752_v8  ;;  %v740_v13 = vmax.f32 %v724_v11, 0.0  ;;  %v728_v17 = vadd.f32 %v721_v41, %v711_v1  ;;  %v729_v29 = vadd.f32 %v721_v41, %v712_v2 }
 0x43f   :  { %v741_v18 = vmax.f32 %v725_v12, 0.0  ;;  %v742_v35 = vmax.f32 %v726_v15, 0.0  ;;  %v743_v26 = vmax.f32 %v727_v16, 0.0 }
 0x440   :  { %v744_v36 = vmax.f32 %v728_v17, 0.0  ;;  %v745_v30 = vmax.f32 %v729_v29, 0.0 }
 0x441   :  { %v755_v38 = vpack.c.bf16 %v741_v18, %v740_v13  ;;  %v756_v28 = vpack.c.bf16 %v743_v26, %v742_v35 }
 0x442   :  { %v757_v37 = vpack.c.bf16 %v745_v30, %v744_v36 }
 0x44d   :  { %843 = vmatmul.bf16.gmra.mxu2 %v755_v38 }
 0x45d   :  { %848 = vmatmul.bf16.gmra.mxu2 %v756_v28 }
 0x46d   :  { %853 = vmatmul.bf16.gmra.mxu2 %v757_v37 }
 0x47d   :  { %858 = vmatmul.bf16.gmra.mxu2 %v758_v20 }
 0x48d   :  { %863 = vmatmul.bf16.gmra.mxu2 %v759_v59 }
 0x49d   :  { %868 = vmatmul.bf16.gmra.mxu2 %v760_v10 }
 0x4ad   :  { %873 = vmatmul.bf16.gmra.mxu2 %v761_v0 }
 0x4c0   :  { %v839_v27 = vpop.f32.mrf.mxu2 }
 0x4c1   :  { %v840_v31 = vadd.f32 %v1121_v25, %v839_v27 }
 0x4c3   :  { %879 = vst [vmem:[%s1558_s6] sm:$0xff] %v840_v31 }
 0x4c8   :  { %v841_v61 = vpop.f32.mrf.mxu2 }
 0x4c9   :  { %v842_v63 = vadd.f32 %v1121_v25, %v841_v61 }
 0x4cb   :  { %880 = vst [vmem:[%s1558_s6 + $0x8] sm:$0xff] %v842_v63 }
 0x4d0   :  { %v844_v39 = vpop.f32.mrf.mxu2 }
 0x4d1   :  { %v845_v40 = vadd.f32 %v1121_v25, %v844_v39 }
 0x4d3   :  { %881 = vst [vmem:[%s1558_s6 + $0x10] sm:$0xff] %v845_v40 }
 0x4d8   :  { %v846_v41 = vpop.f32.mrf.mxu2 }
 0x4d9   :  { %v847_v42 = vadd.f32 %v1121_v25, %v846_v41 }
 0x4db   :  { %882 = vst [vmem:[%s1558_s6 + $0x18] sm:$0xff] %v847_v42 }
 0x4e0   :  { %v849_v32 = vpop.f32.mrf.mxu2 }
 0x4e1   :  { %v850_v43 = vadd.f32 %v1121_v25, %v849_v32 }
 0x4e3   :  { %883 = vst [vmem:[%s1558_s6 + $0x20] sm:$0xff] %v850_v43 }
 0x4e8   :  { %v851_v44 = vpop.f32.mrf.mxu2 }
 0x4e9   :  { %v852_v33 = vadd.f32 %v1121_v25, %v851_v44 }
 0x4eb   :  { %884 = vst [vmem:[%s1558_s6 + $0x28] sm:$0xff] %v852_v33 }
 0x4f0   :  { %v854_v34 = vpop.f32.mrf.mxu2 }
 0x4f1   :  { %v855_v45 = vadd.f32 %v1121_v25, %v854_v34 }
 0x4f3   :  { %885 = vst [vmem:[%s1558_s6 + $0x30] sm:$0xff] %v855_v45 }
 0x4f8   :  { %v856_v46 = vpop.f32.mrf.mxu2 }
 0x4f9   :  { %v857_v47 = vadd.f32 %v1121_v25, %v856_v46 }
 0x4fb   :  { %886 = vst [vmem:[%s1558_s6 + $0x38] sm:$0xff] %v857_v47 }
 0x500   :  { %v859_v48 = vpop.f32.mrf.mxu2 }
 0x501   :  { %v860_v49 = vadd.f32 %v1121_v25, %v859_v48 }
 0x503   :  { %887 = vst [vmem:[%s1558_s6 + $0x40] sm:$0xff] %v860_v49 }
 0x508   :  { %v861_v24 = vpop.f32.mrf.mxu2 }
 0x509   :  { %v862_v50 = vadd.f32 %v1121_v25, %v861_v24 }
 0x50b   :  { %888 = vst [vmem:[%s1558_s6 + $0x48] sm:$0xff] %v862_v50 }
 0x510   :  { %v864_v51 = vpop.f32.mrf.mxu2 }
 0x511   :  { %v865_v22 = vadd.f32 %v1121_v25, %v864_v51 }
 0x513   :  { %889 = vst [vmem:[%s1558_s6 + $0x50] sm:$0xff] %v865_v22 }
 0x518   :  { %v866_v23 = vpop.f32.mrf.mxu2 }
 0x519   :  { %v867_v52 = vadd.f32 %v1121_v25, %v866_v23 }
 0x51b   :  { %890 = vst [vmem:[%s1558_s6 + $0x58] sm:$0xff] %v867_v52 }
 0x520   :  { %v869_v53 = vpop.f32.mrf.mxu2 }
 0x521   :  { %v870_v54 = vadd.f32 %v1121_v25, %v869_v53 }
 0x523   :  { %891 = vst [vmem:[%s1558_s6 + $0x60] sm:$0xff] %v870_v54 }
 0x528   :  { %v871_v3 = vpop.f32.mrf.mxu2 }
 0x529   :  { %v872_v4 = vadd.f32 %v1121_v25, %v871_v3 }
 0x52b   :  { %892 = vst [vmem:[%s1558_s6 + $0x68] sm:$0xff] %v872_v4 }
 0x530   :  { %v874_v55 = vpop.f32.mrf.mxu2 }
 0x531   :  { %v875_v5 = vadd.f32 %v1121_v25, %v874_v55 }
 0x533   :  { %893 = vst [vmem:[%s1558_s6 + $0x70] sm:$0xff] %v875_v5 }
 0x538   :  { %v876_v56 = vpop.f32.mrf.mxu2 }
 0x539   :  { %v877_v6 = vadd.f32 %v1121_v25, %v876_v56 }
 0x53b   :  { %894 = vst [vmem:[%s1558_s6 + $0x78] sm:$0xff] %v877_v6 }
 0x53c   :  { %899 = vsyncpa [#allocation3], 1 }

</bundles_post_ra>
